<compile_context>
chip_gen: v6e
topology: v6e:2x2x1
jax: 0.10.0
libtpu: 0.0.40
codegen_flags: <defaults>
</compile_context>

<pallas_src>
import numpy as np
import jax
import jax.numpy as jnp
from jax.experimental import pallas as pl
from jax.experimental.pallas import tpu as pltpu


# ----------------------------- pltpu.roll direction probe -----------------------------

_ROLL_JNP_STYLE = None  # True  <=>  pltpu.roll(x, s, axis)[i] == x[(i - s) % n]  (jnp.roll)


def _probe_roll_semantics():
    """Pin down pltpu.roll's rotation direction once, host-side (must run outside jit)."""
    global _ROLL_JNP_STYLE
    if _ROLL_JNP_STYLE is None:
        def kern(x_ref, o_ref):
            o_ref[...] = pltpu.roll(x_ref[...], shift=1, axis=1)

        x = jnp.tile(jnp.arange(128, dtype=jnp.float32)[None, :], (8, 1))
        y = pl.pallas_call(kern, out_shape=jax.ShapeDtypeStruct((8, 128), jnp.float32))(x)
        _ROLL_JNP_STYLE = bool(jax.device_get(y[0, 1]) == 0.0)
    return _ROLL_JNP_STYLE


# ----------------------------- in-kernel helpers (pure value math) -----------------------------

def _conv3x3(x, cfg, tap_ref, w_ref, s_ref):
    """3x3 conv (padding=1) + folded-BN shift + ReLU in (channels, pixels) layout.

    x: (Cin, L) float.  w_ref: (Cout, 9*Cin) bf16 im2col weights (BN scale folded).
    s_ref: (Cout, 1) f32 folded-BN shift.
    tap_ref: (9, L) bf16 edge masks (roll path) or (9, L, L) bf16 gather matrices."""
    xb = x.astype(jnp.bfloat16)
    taps = []
    if cfg["roll"]:
        m = tap_ref[...]                                          # (9, L) 0/1 masks
        for k in range(9):
            s = cfg["shifts"][k]
            if s == 0:
                taps.append(xb)                                   # centre tap: identity
            else:
                taps.append(pltpu.roll(xb, shift=s, axis=1) * m[k:k + 1, :])
    else:
        for k in range(9):                                        # tiny stages only
            g = jnp.dot(xb, tap_ref[k], preferred_element_type=jnp.float32)
            taps.append(g.astype(jnp.bfloat16))
    xcol = jnp.concatenate(taps, axis=0)                          # (9*Cin, L) im2col block
    y = jnp.dot(w_ref[...], xcol, preferred_element_type=jnp.float32)
    return jnp.maximum(y + s_ref[...], 0.0)


def _maxpool2x2(x, cfg, pool_ref):
    """MaxPool2d(2).  Roll path: 2 rolls + max, then one stride-2 0/1 selection matmul.
    Gather path (lane width < 128): 4 selection matmuls + max (exact, tiny)."""
    if cfg["roll"]:
        m = jnp.maximum(x, pltpu.roll(x, shift=cfg["s1"], axis=1))
        m = jnp.maximum(m, pltpu.roll(m, shift=cfg["sW"], axis=1))
        return jnp.dot(m.astype(jnp.bfloat16), pool_ref[...],
                       preferred_element_type=jnp.float32)
    xb = x.astype(jnp.bfloat16)
    t0 = jnp.dot(xb, pool_ref[0], preferred_element_type=jnp.float32)
    t1 = jnp.dot(xb, pool_ref[1], preferred_element_type=jnp.float32)
    t2 = jnp.dot(xb, pool_ref[2], preferred_element_type=jnp.float32)
    t3 = jnp.dot(xb, pool_ref[3], preferred_element_type=jnp.float32)
    return jnp.maximum(jnp.maximum(t0, t1), jnp.maximum(t2, t3))


def _build_unet_kernel(c16, c8, c4, p1, p2):
    """Whole UNet forward as one kernel body; cfg dicts are static Python data."""

    def kernel(x_ref, t16, t8, t4, ps1, ps2, u48, u816,
               w_a1, s_a1, w_a2, s_a2, w_b1, s_b1, w_b2, s_b2,
               w_c1, s_c1, w_c2, s_c2, w_d1, s_d1, w_d2, s_d2,
               w_e1, s_e1, w_e2, s_e2, w_f1, s_f1, w_f2, s_f2,
               w_o, b_o, out_ref):
        x0 = x_ref[0]                                             # (16, L16) f32

        # inc: ConvBlock(10(pad 16) -> 16) at 16x16
        h = _conv3x3(x0, c16, t16, w_a1, s_a1)
        x1 = _conv3x3(h, c16, t16, w_a2, s_a2)                    # (16, L16)

        # down1: pool -> ConvBlock(16 -> 32) at 8x8
        h = _maxpool2x2(x1, p1, ps1)                              # (16, L8)
        h = _conv3x3(h, c8, t8, w_b1, s_b1)
        x2 = _conv3x3(h, c8, t8, w_b2, s_b2)                      # (32, L8)

        # down2: pool -> ConvBlock(32 -> 64) at 4x4
        h = _maxpool2x2(x2, p2, ps2)                              # (32, L4)
        h = _conv3x3(h, c4, t4, w_c1, s_c1)
        x3 = _conv3x3(h, c4, t4, w_c2, s_c2)                      # (64, L4)

        # bottleneck: ConvBlock(64 -> 64) at 4x4
        h = _conv3x3(x3, c4, t4, w_d1, s_d1)
        bnk = _conv3x3(h, c4, t4, w_d2, s_d2)                     # (64, L4)

        # up1: bilinear 4->8, concat([x2, up]) -> ConvBlock(96 -> 32, mid 32)
        u = jnp.dot(bnk, u48[...], preferred_element_type=jnp.float32)      # (64, L8)
        h = _conv3x3(jnp.concatenate([x2, u], axis=0), c8, t8, w_e1, s_e1)
        h = _conv3x3(h, c8, t8, w_e2, s_e2)                       # (32, L8)

        # up2: bilinear 8->16, concat([x1, up]) -> ConvBlock(48 -> 16, mid 16)
        u = jnp.dot(h, u816[...], preferred_element_type=jnp.float32)       # (32, L16)
        h = _conv3x3(jnp.concatenate([x1, u], axis=0), c16, t16, w_f1, s_f1)
        h = _conv3x3(h, c16, t16, w_f2, s_f2)                     # (16, L16)

        # outc: 1x1 conv (10 classes padded to 16) + bias -- lane-dense store.
        logits = jnp.dot(w_o[...], h.astype(jnp.bfloat16),
                         preferred_element_type=jnp.float32) + b_o[...]
        out_ref[0] = logits.astype(out_ref.dtype)

    return kernel


# ----------------------------- static per-stage configuration -----------------------------

def _stage_cfgs(H, W, G, jnp_style):
    """Static roll-shift / mode config for the 3 resolutions and 2 pools."""
    def stage(h_img, w_img):
        L = G * h_img * w_img
        roll = (L % 128 == 0)                       # lane rotates only on lane-dense widths
        offs = [dy * w_img + dx for dy in (-1, 0, 1) for dx in (-1, 0, 1)]
        shifts = tuple(((-o) % L) if jnp_style else (o % L) for o in offs)
        return {"L": L, "roll": roll, "shifts": shifts, "w_img": w_img}

    def pool(cfg):
        L, w_img = cfg["L"], cfg["w_img"]
        return {"roll": cfg["roll"],
                "s1": ((-1) % L) if jnp_style else (1 % L),
                "sW": ((-w_img) % L) if jnp_style else (w_img % L)}

    c16, c8, c4 = stage(H, W), stage(H // 2, W // 2), stage(H // 4, W // 4)
    return c16, c8, c4, pool(c16), pool(c8)


# ----------------------------- host-side constant matrices -----------------------------

def _tap_mask(h_img, w_img):
    """(9, HW) 0/1 validity mask per 3x3 tap (k = (dy+1)*3 + (dx+1))."""
    m = np.zeros((9, h_img * w_img), np.float32)
    k = 0
    for dy in (-1, 0, 1):
        for dx in (-1, 0, 1):
            for h in range(h_img):
                for w in range(w_img):
                    if 0 <= h + dy < h_img and 0 <= w + dx < w_img:
                        m[k, h * w_img + w] = 1.0
            k += 1
    return m


def _conv_gather_T(h_img, w_img):
    """(9, HW, HW) 0/1 gather matrices: (X @ T[k])[:, p] = X[:, p + off_k] (zero-padded)."""
    HW = h_img * w_img
    out = np.zeros((9, HW, HW), np.float32)
    for k in range(9):
        dy, dx = k // 3 - 1, k % 3 - 1
        for h in range(h_img):
            for w in range(w_img):
                sh, sw = h + dy, w + dx
                if 0 <= sh < h_img and 0 <= sw < w_img:
                    out[k, sh * w_img + sw, h * w_img + w] = 1.0
    return out


def _pool_select(h_img, w_img):
    """(HW, HW/4) 0/1 stride-2 selection (picks the 2x2-window max left at (2i, 2j))."""
    Ho, Wo = h_img // 2, w_img // 2
    S = np.zeros((h_img * w_img, Ho * Wo), np.float32)
    for i in range(Ho):
        for j in range(Wo):
            S[(2 * i) * w_img + 2 * j, i * Wo + j] = 1.0
    return S


def _pool_gather_T(h_img, w_img):
    """(4, HW, HW/4) 0/1 selection matrices: tap t=(dy,dx) of the 2x2 pooling window."""
    Ho, Wo = h_img // 2, w_img // 2
    out = np.zeros((4, h_img * w_img, Ho * Wo), np.float32)
    for t in range(4):
        dy, dx = t // 2, t % 2
        for i in range(Ho):
            for j in range(Wo):
                out[t, (2 * i + dy) * w_img + (2 * j + dx), i * Wo + j] = 1.0
    return out


def _upsample_bilinear_T(h_img, w_img):
    """(HW, 4*HW) transposed bilinear-2x interpolation matrix, align_corners=True (f32)."""
    def interp(n_out, n_in):
        R = np.zeros((n_out, n_in), np.float32)
        for o in range(n_out):
            src = o * (n_in - 1) / (n_out - 1) if n_out > 1 else 0.0
            i0 = min(int(np.floor(src)), n_in - 1)
            i1 = min(i0 + 1, n_in - 1)
            f = src - i0
            R[o, i0] += 1.0 - f
            R[o, i1] += f
        return R
    U = np.kron(interp(2 * h_img, h_img), interp(2 * w_img, w_img))   # (4HW, HW)
    return np.ascontiguousarray(U.T)                                   # (HW, 4HW)


def _block_diag(G, M):
    return np.kron(np.eye(G, dtype=np.float32), M)


def _build_consts(H, W, G, c16, c8, c4, p1, p2):
    def tap_const(h_img, w_img, cfg):
        if cfg["roll"]:
            return jnp.asarray(np.tile(_tap_mask(h_img, w_img), (1, G)), jnp.bfloat16)
        t = _conv_gather_T(h_img, w_img)
        t = np.stack([_block_diag(G, t[k]) for k in range(9)])
        return jnp.asarray(t, jnp.bfloat16)

    def pool_const(h_img, w_img, pcfg):
        if pcfg["roll"]:
            return jnp.asarray(_block_diag(G, _pool_select(h_img, w_img)), jnp.bfloat16)
        t = _pool_gather_T(h_img, w_img)
        t = np.stack([_block_diag(G, t[i]) for i in range(4)])
        return jnp.asarray(t, jnp.bfloat16)

    def up_const(h_img, w_img):
        return jnp.asarray(_block_diag(G, _upsample_bilinear_T(h_img, w_img)), jnp.float32)

    return [tap_const(H, W, c16),
            tap_const(H // 2, W // 2, c8),
            tap_const(H // 4, W // 4, c4),
            pool_const(H, W, p1),
            pool_const(H // 2, W // 2, p2),
            up_const(H // 4, W // 4),
            up_const(H // 2, W // 2)]


# ----------------------------- parameters -----------------------------

def _round_up(x, m):
    return ((x + m - 1) // m) * m


def _init_conv_bn(key, cin, cout, cin_pad=None):
    """Random conv (torch OIHW) + eval-mode BN folded into an im2col weight:
    w: (Cout, 9*Cin[_pad]) bf16 (column order k*Cin + c, k = ky*3+kx), s: (Cout, 1) f32."""
    kw, kg, kb, km, kv = jax.random.split(key, 5)
    w = jax.random.normal(kw, (cout, cin, 3, 3), jnp.float32) / np.sqrt(9.0 * cin)
    gamma = 1.0 + 0.1 * jax.random.normal(kg, (cout,), jnp.float32)
    beta = 0.1 * jax.random.normal(kb, (cout,), jnp.float32)
    mean = 0.1 * jax.random.normal(km, (cout,), jnp.float32)
    var = 0.5 + jax.random.uniform(kv, (cout,), jnp.float32)
    scale = gamma / jnp.sqrt(var + 1e-5)
    shift = beta - mean * scale
    ws = w * scale[:, None, None, None]                          # fold BN scale into weights
    if cin_pad is not None and cin_pad > cin:
        ws = jnp.pad(ws, ((0, 0), (0, cin_pad - cin), (0, 0), (0, 0)))
    cin_eff = ws.shape[1]
    wcol = jnp.transpose(ws, (0, 2, 3, 1)).reshape(cout, 9 * cin_eff)
    return {"w": wcol.astype(jnp.bfloat16),
            "s": shift.reshape(cout, 1).astype(jnp.float32)}


def _init_convblock(key, cin, cout, cmid=None, cin_pad=None):
    cmid = cmid or cout
    k1, k2 = jax.random.split(key)
    return {"c1": _init_conv_bn(k1, cin, cmid, cin_pad), "c2": _init_conv_bn(k2, cmid, cout)}


def _init_outconv(key, cin, cout, cout_pad):
    kw, kb = jax.random.split(key)
    w = jax.random.normal(kw, (cout, cin), jnp.float32) / np.sqrt(cin)
    b = 0.1 * jax.random.normal(kb, (cout,), jnp.float32)
    wp = jnp.pad(w, ((0, cout_pad - cout), (0, 0)))
    bp = jnp.pad(b, (0, cout_pad - cout)).reshape(cout_pad, 1)
    return {"w": wp.astype(jnp.bfloat16), "b": bp.astype(jnp.float32)}


def init_unet_params(key, n_in=10, n_out=10):
    _probe_roll_semantics()                         # host-side, before any jit of the forward
    n_in_pad = _round_up(n_in, 8)                   # 10 -> 16
    n_out_pad = _round_up(n_out, 8)                 # 10 -> 16
    ks = jax.random.split(key, 7)
    return {
        "inc": _init_convblock(ks[0], n_in, 16, cin_pad=n_in_pad),
        "down1": _init_convblock(ks[1], 16, 32),
        "down2": _init_convblock(ks[2], 32, 64),
        "bottleneck": _init_convblock(ks[3], 64, 64),
        "up1": _init_convblock(ks[4], 32 + 64, 32, cmid=32),   # concat [skip(32), up(64)]
        "up2": _init_convblock(ks[5], 16 + 32, 16, cmid=16),   # concat [skip(16), up(32)]
        "outc": _init_outconv(ks[6], 16, n_out, n_out_pad),
    }


def _flatten_params(p):
    f = []
    for name in ("inc", "down1", "down2", "bottleneck", "up1", "up2"):
        for c in ("c1", "c2"):
            f += [p[name][c]["w"], p[name][c]["s"]]
    f += [p["outc"]["w"], p["outc"]["b"]]
    return f


def _const_spec(a):
    nd = a.ndim
    return pl.BlockSpec(tuple(a.shape), lambda n, _nd=nd: (0,) * _nd)


def _default_images_per_step(batch, hw):
    """Dual-TensorCore chips (v7x/v4/v5p): one image per grid step, batch sharded across
    cores by the 'parallel' grid axis.  Single-TC v5e/v6e: lane-stack the batch."""
    try:
        kind = jax.devices()[0].device_kind.lower().replace(" ", "")
    except Exception:
        kind = ""
    if any(t in kind for t in ("v7", "7x", "v4", "v5p")):
        return 1
    g = batch
    while g > 1 and (batch % g != 0 or g * hw > 4096):
        g -= 1
    return max(g, 1)


# ----------------------------- UNet forward (single fused pallas_call) -----------------------------

def unet_forward(x_nchw, params, *, n_out=10, images_per_step=None):
    N, Cin, H, W = x_nchw.shape
    HW = H * W
    cpad = params["inc"]["c1"]["w"].shape[1] // 9     # padded input channels (16)
    n_out_pad = params["outc"]["w"].shape[0]          # padded output channels (16)

    G = images_per_step if images_per_step is not None else _default_images_per_step(N, HW)
    if N % G != 0:
        G = 1
    jnp_style = _ROLL_JNP_STYLE if _ROLL_JNP_STYLE is not None else True

    c16, c8, c4, p1, p2 = _stage_cfgs(H, W, G, jnp_style)
    consts = _build_consts(H, W, G, c16, c8, c4, p1, p2)
    kernel = _build_unet_kernel(c16, c8, c4, p1, p2)
    flat = _flatten_params(params)

    x = x_nchw.astype(jnp.float32)
    if cpad > Cin:
        x = jnp.pad(x, ((0, 0), (0, cpad - Cin), (0, 0), (0, 0)))
    # (N, C, H, W) -> (N/G, C, G*HW): G images lane-stacked along the pixel axis.
    x = x.reshape(N // G, G, cpad, HW).transpose(0, 2, 1, 3).reshape(N // G, cpad, G * HW)

    L16 = G * HW
    in_specs = [pl.BlockSpec((1, cpad, L16), lambda n: (n, 0, 0))]
    in_specs += [_const_spec(a) for a in consts]
    in_specs += [_const_spec(a) for a in flat]

    out = pl.pallas_call(
        kernel,
        out_shape=jax.ShapeDtypeStruct((N // G, n_out_pad, L16), jnp.float32),
        grid=(N // G,),
        in_specs=in_specs,
        out_specs=pl.BlockSpec((1, n_out_pad, L16), lambda n: (n, 0, 0)),
        compiler_params=pltpu.CompilerParams(dimension_semantics=("parallel",)),
    )(x, *consts, *flat)

    out = out.reshape(N // G, n_out_pad, G, HW).transpose(0, 2, 1, 3).reshape(N, n_out_pad, H, W)
    return out[:, :n_out]                              # slice padded classes, already NCHW


# ----------------------------- main -----------------------------

if __name__ == "__main__":
    key = jax.random.PRNGKey(0)
    kx, kp = jax.random.split(key)
    # (B, NumInputChannels, H, W) = (2, 10, 16, 16), matching the PyTorch module.
    x = jax.random.normal(kx, (2, 10, 16, 16), jnp.float32)
    params = init_unet_params(kp, n_in=10, n_out=10)

    logits = jax.jit(unet_forward)(x, params)
    logits = jax.block_until_ready(logits)

    assert logits.shape == (2, 10, 16, 16), logits.shape
    assert bool(jnp.all(jnp.isfinite(logits)))
    print("KERNEL_OK")
</pallas_src>

<mosaic_0001>
module attributes {stable_mosaic.version = 11 : i64} {
  func.func @kern(%arg0: memref<8x128xf32, #tpu.memory_space<vmem>>, %arg1: memref<8x128xf32, #tpu.memory_space<vmem>>) attributes {dimension_semantics = [], scalar_prefetch = 0 : i64, scratch_operands = 0 : i64, tpu.core_type = #tpu.core_type<tc>} {
    %c0 = arith.constant 0 : index
    %c0_0 = arith.constant 0 : index
    %0 = vector.load %arg0[%c0, %c0_0] : memref<8x128xf32, #tpu.memory_space<vmem>>, vector<8x128xf32>
    %c1_i32 = arith.constant 1 : i32
    %1 = tpu.dynamic_rotate %0 by %c1_i32 dim 1 : vector<8x128xf32>, i32 -> vector<8x128xf32>
    %c0_1 = arith.constant 0 : index
    %c0_2 = arith.constant 0 : index
    %2 = vector.load %arg1[%c0_1, %c0_2] : memref<8x128xf32, #tpu.memory_space<vmem>>, vector<8x128xf32>
    tpu.vector_store %arg1[%c0_1, %c0_2], %1 {strides = array<i32>} : memref<8x128xf32, #tpu.memory_space<vmem>>, vector<8x128xf32>,
    return
  }
}

</mosaic_0001>

<bundles_post_ra>
// kernel: tpu_custom_call.1
= control target key start
LH: loop header
LB: loop body
LE: loop exit
PB: predicated region body
PF: predicated region fallthrough
CT: control target
= control target key end

     0   :  { %6 = vsyncpa [#allocation3], 0  ;;  %s106_s0 = inlined_call_operand.hbm [shape: f32[8,128], index: 0, kind: input, shape index: {}]   ;;  %s107_s1 = inlined_call_operand.hbm [shape: f32[8,128], index: 1, kind: output, shape index: {}]  }
   0x1   :  { %7 = vsyncpa [#allocation4], 0  ;;  %s87_s6 = smov [#allocation2]  }
   0x2   :  { %s14_s7 = sshll.u32 %s87_s6, 4  ;;  %s15_s7 = int_to_ptr.vmem [resolvable:$true] %s14_s7 }
   0x3   :  { %s51_s8 = scalar_lea.vmem %s15_s7, 128  ;;  %p56_p1 = scmp.lt.s32.totalorder %s15_s7, %s15_s7 }
   0x4   :  { %p52_p0 = scmp.ne.s32.totalorder %s15_s7, %s51_s8  ;;  %p57_p2 = scmp.lt.s32.totalorder %s51_s8, %s51_s8 }
   0x6   :  { %p58_p3 = por %p57_p2, %p56_p1 }
   0x8   :  { %p59_p4 = pnand %p58_p3, %p52_p0 }
   0xa   :  { %62 = shalt.err (!%p59_p4)
}
   0xb   :  { %17 = dma.hbm_to_vmem [thread:$0]  %s106_s0, 128, %s15_s7, [#allocation3]  }
   0xc   :  { %83 = dma.done.wait [#allocation3], 128  }
   0xd   :  { %84 = vsyncadd [#allocation3], 4294967168  ;;  %v21_v0 = vld [vmem:[#allocation2] sm:$0xff]  ;;  %s88_s11 = smov 1   ;;  %s89_s12 = smov [#allocation5]  }
   0xe   :  { %22 = vrot.lane.b32.xlu0 %v21_v0, %s88_s11  ;;  %s31_s13 = sshll.u32 %s89_s12, 4  ;;  %s32_s13 = int_to_ptr.vmem [resolvable:$true] %s31_s13 }
   0xf   :  { %s63_s14 = scalar_lea.vmem %s32_s13, 128  ;;  %p68_p6 = scmp.lt.s32.totalorder %s32_s13, %s32_s13 }
  0x10   :  { %p64_p5 = scmp.ne.s32.totalorder %s32_s13, %s63_s14  ;;  %p69_p7 = scmp.lt.s32.totalorder %s63_s14, %s63_s14 }
  0x12   :  { %p70_p8 = por %p69_p7, %p68_p6 }
  0x14   :  { %p71_p9 = pnand %p70_p8, %p64_p5 }
  0x80   :  { %v23_v1 = vpop.permute.xlu0 %22 }
  0x81   :  { %24 = vst [vmem:[#allocation5] sm:$0xff] %v23_v1 }
  0x82   :  { %74 = shalt.err (!%p71_p9)
}
  0x83   :  { %34 = dma.vmem_to_hbm [thread:$0]  %s32_s13, 128, %s107_s1, [#allocation4]  }
  0x84   :  { %85 = dma.done.wait [#allocation4], 128  }
  0x85   :  { %86 = vsyncadd [#allocation4], 4294967168 }
  0x86   :  { %38 = vsyncpa [#allocation3], 1 }
  0x87   :  { %39 = vsyncpa [#allocation4], 1 }

</bundles_post_ra>
